<compile_context>
chip_gen: v7x
topology: tpu7x:2x2x1
jax: 0.10.0
libtpu: 0.0.40
codegen_flags: <defaults>
</compile_context>

<pallas_src>
import jax
import jax.numpy as jnp
from jax.experimental import pallas as pl
from jax.experimental.pallas import tpu as pltpu

LAMB = 1500.0


def _make_kernel(n_rows, tile_n):
    """Build the per-row-block kernel; n_rows/tile_n are static Python ints."""

    def kernel(cos_ref, side_ref, part_ref):
        blk = pl.program_id(0)
        cos = cos_ref[...].astype(jnp.float32)   # (TN, C)  bf16/f32 -> f32
        side = side_ref[...]                     # (TN, 2)  f32: [cos_t, out_t]
        cos_t = side[:, 0:1]                     # (TN, 1)  original target logit
        out_t = side[:, 1:2]                     # (TN, 1)  modified target logit

        # Row LSE of the modified logits via per-row correction of the plain
        # row LSE (modified row == cos with column t_i replaced by out_t).
        # m >= every modified logit, and cos_t <= rowmax(cos) <= m always.
        m = jnp.maximum(jnp.max(cos, axis=-1, keepdims=True), out_t)      # (TN,1)
        s = jnp.sum(jnp.exp(cos - m), axis=-1, keepdims=True)             # (TN,1)
        s = jnp.maximum(s - jnp.exp(cos_t - m), 0.0) + jnp.exp(out_t - m)
        nll = (m + jnp.log(s)) - out_t                                    # -log p(t_i)

        # Mask padded remainder rows (last grid block) out of the partial sum.
        # NOTE: must stay a select (non-propagating) — padded rows may be NaN.
        row = jax.lax.broadcasted_iota(jnp.int32, nll.shape, 0) + blk * tile_n
        nll = jnp.where(row < n_rows, nll, 0.0)

        # Lane-dense partial-sum block; reduced to a scalar in the wrapper.
        part_ref[...] = jnp.full(part_ref.shape, jnp.sum(nll), jnp.float32)

    return kernel


def a_softmax_loss(cos_theta, phi_theta, target, *, tile_n_max=512):
    """cos_theta, phi_theta: (N, C) f32/bf16; target: (N,) int -> scalar f32 loss."""
    n, c = cos_theta.shape
    tgt = target.reshape(n, 1).astype(jnp.int32)
    scale = jnp.float32(1.0 / (1.0 + LAMB))

    # Only phi[i, t_i] / cos[i, t_i] matter: gather cheap (N,1) vectors in XLA
    # instead of DMA-ing the full phi array, and pack them into one (N,2) side
    # input (one small DMA per grid step).
    cos_t = jnp.take_along_axis(cos_theta, tgt, axis=1).astype(jnp.float32)
    phi_t = jnp.take_along_axis(phi_theta, tgt, axis=1).astype(jnp.float32)
    out_t = cos_t + (phi_t - cos_t) * scale          # modified target logit
    side = jnp.concatenate([cos_t, out_t], axis=1)   # (N, 2) f32

    # Row-tile sizing: ~2 MiB per input tile already saturates HBM; keeps lots
    # of VMEM headroom for the f32 temporaries on v7x (64 MiB/TC).
    itemsize = jnp.dtype(cos_theta.dtype).itemsize
    rows_by_vmem = max(8, (2 * 1024 * 1024) // max(1, c * itemsize))
    tile_n = max(8, (min(tile_n_max, rows_by_vmem) // 8) * 8)
    if n >= 16:
        # v7x megacore: guarantee >= 2 grid blocks so both TCs get work.
        half_rows = max(8, ((-(-n // 2) + 7) // 8) * 8)
        tile_n = min(tile_n, half_rows)
    if n <= tile_n:
        tile_n = n                                   # single block == full dim
    num_blocks = -(-n // tile_n)

    # VMEM budget: double-buffered input tiles + ~3 f32-sized temporaries
    # (cast / exp / reductions) + headroom, capped at 32 MiB for v7x.
    tile_bytes = tile_n * c * itemsize
    f32_tile = tile_n * c * 4
    vmem_limit = int(min(32 << 20, max(8 << 20, 2 * tile_bytes + 3 * f32_tile + (2 << 20))))

    cost = pl.CostEstimate(
        flops=4 * n * c + 8 * n,
        transcendentals=n * c + 3 * n,
        bytes_accessed=n * c * itemsize + n * 2 * 4 + num_blocks * 8 * 128 * 4,
    )

    partials = pl.pallas_call(
        _make_kernel(n, tile_n),
        out_shape=jax.ShapeDtypeStruct((num_blocks, 8, 128), jnp.float32),
        grid=(num_blocks,),
        in_specs=[
            pl.BlockSpec((tile_n, c), lambda i: (i, 0)),   # cos_theta tile
            pl.BlockSpec((tile_n, 2), lambda i: (i, 0)),   # packed [cos_t, out_t]
        ],
        out_specs=pl.BlockSpec((1, 8, 128), lambda i: (i, 0, 0)),
        compiler_params=pltpu.CompilerParams(
            dimension_semantics=("parallel",),
            vmem_limit_bytes=vmem_limit,
        ),
        cost_estimate=cost,
    )(cos_theta, side)

    return jnp.sum(partials[:, 0, 0]) / jnp.float32(n)


def a_softmax_loss_ref(cos_theta, phi_theta, target):
    """Pure-JAX reference mirroring the PyTorch forward."""
    cos = cos_theta.astype(jnp.float32)
    phi = phi_theta.astype(jnp.float32)
    n, c = cos.shape
    onehot = jax.nn.one_hot(target, c, dtype=jnp.float32)
    out = cos + onehot * (phi - cos) * (1.0 / (1.0 + LAMB))
    logp = jax.nn.log_softmax(out, axis=-1)
    logpt = jnp.take_along_axis(logp, target.reshape(-1, 1), axis=1).reshape(-1)
    return jnp.mean(-logpt)


# TODO(synk): the module's self.iter counter / lamb-annealing bookkeeping is
# Python-side state with no effect on this forward's returned loss (lamb stays
# 1500.0), so it is intentionally not modeled in the kernel.
# TODO(synk): for very large class counts (>=500K, face-ID heads) add a second
# grid axis over C with an online running max/sum in VMEM scratch; current
# design keeps the full class row of one tile in VMEM.

if __name__ == "__main__":
    # Small case matching the module's expected (N, C) logits + (N,) targets.
    k1, k2, k3 = jax.random.split(jax.random.PRNGKey(0), 3)
    N, C = 8, 16
    cos = jax.random.normal(k1, (N, C), dtype=jnp.float32)
    phi = jax.random.normal(k2, (N, C), dtype=jnp.float32)
    tgt = jax.random.randint(k3, (N,), 0, C, dtype=jnp.int32)
    loss = a_softmax_loss(cos, phi, tgt)
    jax.block_until_ready(loss)
    ref = a_softmax_loss_ref(cos, phi, tgt)
    assert jnp.allclose(loss, ref, atol=1e-5, rtol=1e-5), (loss, ref)

    # Multi-block grid with a remainder block (exercises tiling + row masking).
    k4, k5, k6 = jax.random.split(jax.random.PRNGKey(0), 3)
    N2, C2 = 300, 256
    cos2 = jax.random.normal(k4, (N2, C2), dtype=jnp.float32)
    phi2 = jax.random.normal(k5, (N2, C2), dtype=jnp.float32)
    tgt2 = jax.random.randint(k6, (N2,), 0, C2, dtype=jnp.int32)
    loss2 = a_softmax_loss(cos2, phi2, tgt2, tile_n_max=128)
    jax.block_until_ready(loss2)
    ref2 = a_softmax_loss_ref(cos2, phi2, tgt2)
    assert jnp.allclose(loss2, ref2, atol=1e-5, rtol=1e-5), (loss2, ref2)

    # bf16 inputs: travel HBM->VMEM as bf16, cast to f32 inside the kernel.
    cos3 = cos2.astype(jnp.bfloat16)
    phi3 = phi2.astype(jnp.bfloat16)
    loss3 = a_softmax_loss(cos3, phi3, tgt2, tile_n_max=128)
    jax.block_until_ready(loss3)
    ref3 = a_softmax_loss_ref(cos3, phi3, tgt2)
    assert jnp.allclose(loss3, ref3, atol=1e-4, rtol=1e-4), (loss3, ref3)

    print("KERNEL_OK")
</pallas_src>

<mosaic_0001>
module attributes {stable_mosaic.version = 11 : i64} {
  func.func @kernel(%arg0: i32, %arg1: memref<8x16xf32, #tpu.memory_space<vmem>>, %arg2: memref<8x2xf32, #tpu.memory_space<vmem>>, %arg3: memref<1x8x128xf32, #tpu.memory_space<vmem>>) attributes {dimension_semantics = [#tpu.dimension_semantics<parallel>], iteration_bounds = array<i64: 1>, scalar_prefetch = 0 : i64, scratch_operands = 0 : i64, tpu.core_type = #tpu.core_type<tc>, window_params = [{transform_indices = @transform_0, window_bounds = array<i64: 8, 16>}, {transform_indices = @transform_1, window_bounds = array<i64: 8, 2>}, {transform_indices = @transform_2, window_bounds = array<i64: 1, 8, 128>}]} {
    %c0 = arith.constant 0 : index
    %c0_0 = arith.constant 0 : index
    %0 = vector.load %arg1[%c0, %c0_0] : memref<8x16xf32, #tpu.memory_space<vmem>>, vector<8x16xf32>
    %c0_1 = arith.constant 0 : index
    %c0_2 = arith.constant 0 : index
    %1 = vector.load %arg2[%c0_1, %c0_2] : memref<8x2xf32, #tpu.memory_space<vmem>>, vector<8x2xf32>
    %2 = vector.extract_strided_slice %1 {offsets = [0, 0], sizes = [8, 1], strides = [1, 1]} : vector<8x2xf32> to vector<8x1xf32>
    %3 = vector.extract_strided_slice %1 {offsets = [0, 1], sizes = [8, 1], strides = [1, 1]} : vector<8x2xf32> to vector<8x1xf32>
    %cst = arith.constant dense<0xFF800000> : vector<8xf32>
    %4 = vector.multi_reduction <maximumf>, %0, %cst [1] : vector<8x16xf32> to vector<8xf32>
    %5 = vector.shape_cast %4 : vector<8xf32> to vector<8x1xf32>
    %6 = arith.maximumf %5, %3 : vector<8x1xf32>
    %7 = vector.broadcast %6 : vector<8x1xf32> to vector<8x16xf32>
    %8 = arith.subf %0, %7 : vector<8x16xf32>
    %9 = math.exp %8 : vector<8x16xf32>
    %cst_3 = arith.constant dense<0.000000e+00> : vector<8xf32>
    %10 = vector.multi_reduction <add>, %9, %cst_3 [1] : vector<8x16xf32> to vector<8xf32>
    %11 = vector.shape_cast %10 : vector<8xf32> to vector<8x1xf32>
    %12 = arith.subf %2, %6 : vector<8x1xf32>
    %13 = math.exp %12 : vector<8x1xf32>
    %14 = arith.subf %11, %13 : vector<8x1xf32>
    %cst_4 = arith.constant 0.000000e+00 : f32
    %15 = vector.broadcast %cst_4 : f32 to vector<8x1xf32>
    %16 = arith.maximumf %14, %15 : vector<8x1xf32>
    %17 = arith.subf %3, %6 : vector<8x1xf32>
    %18 = math.exp %17 : vector<8x1xf32>
    %19 = arith.addf %16, %18 : vector<8x1xf32>
    %20 = math.log %19 : vector<8x1xf32>
    %21 = arith.addf %6, %20 : vector<8x1xf32>
    %22 = arith.subf %21, %3 : vector<8x1xf32>
    %23 = tpu.iota {dimensions = array<i32: 0>} : vector<8x1xi32>
    %c8_i32 = arith.constant 8 : i32
    %24 = arith.muli %arg0, %c8_i32 : i32
    %25 = vector.broadcast %24 : i32 to vector<8x1xi32>
    %26 = arith.addi %23, %25 : vector<8x1xi32>
    %c8_i32_5 = arith.constant 8 : i32
    %27 = vector.broadcast %c8_i32_5 : i32 to vector<8x1xi32>
    %28 = arith.cmpi slt, %26, %27 : vector<8x1xi32>
    %cst_6 = arith.constant 0.000000e+00 : f32
    %29 = vector.broadcast %cst_6 : f32 to vector<8x1xf32>
    %30 = arith.select %28, %22, %29 : vector<8x1xi1>, vector<8x1xf32>
    %31 = vector.shape_cast %30 : vector<8x1xf32> to vector<1x8x1xf32>
    %cst_7 = arith.constant dense<0.000000e+00> : vector<1xf32>
    %32 = vector.multi_reduction <add>, %31, %cst_7 [1, 2] : vector<1x8x1xf32> to vector<1xf32>
    %33 = vector.shape_cast %32 : vector<1xf32> to vector<1x1x1xf32>
    %34 = vector.extract %33[0, 0, 0] : f32 from vector<1x1x1xf32>
    %35 = vector.broadcast %34 : f32 to vector<1x8x128xf32>
    %c0_8 = arith.constant 0 : index
    %c0_9 = arith.constant 0 : index
    %c0_10 = arith.constant 0 : index
    %36 = vector.load %arg3[%c0_8, %c0_9, %c0_10] : memref<1x8x128xf32, #tpu.memory_space<vmem>>, vector<1x8x128xf32>
    tpu.vector_store %arg3[%c0_8, %c0_9, %c0_10], %35 {strides = array<i32>} : memref<1x8x128xf32, #tpu.memory_space<vmem>>, vector<1x8x128xf32>,
    return
  }
  func.func @transform_0(%arg0: i32) -> (i32, i32) {
    %c0_i32 = arith.constant 0 : i32
    %c0_i32_0 = arith.constant 0 : i32
    return %arg0, %c0_i32 : i32, i32
  }
  func.func @transform_1(%arg0: i32) -> (i32, i32) {
    %c0_i32 = arith.constant 0 : i32
    %c0_i32_0 = arith.constant 0 : i32
    return %arg0, %c0_i32 : i32, i32
  }
  func.func @transform_2(%arg0: i32) -> (i32, i32, i32) {
    %c0_i32 = arith.constant 0 : i32
    %c0_i32_0 = arith.constant 0 : i32
    %c0_i32_1 = arith.constant 0 : i32
    return %arg0, %c0_i32, %c0_i32_0 : i32, i32, i32
  }
}

</mosaic_0001>

<bundles_post_ra>
// kernel: tpu_custom_call.1
= control target key start
LH: loop header
LB: loop body
LE: loop exit
PB: predicated region body
PF: predicated region fallthrough
CT: control target
= control target key end

     0   :  { %vm14_vm0 = vcmask 130048   ;;  %s173_s0 = inlined_call_operand.vmem [shape: f32[8,16], index: 0, kind: input, shape index: {}]   ;;  %s174_s1 = inlined_call_operand.vmem [shape: f32[8,2], index: 1, kind: input, shape index: {}]   ;;  %s175_s2 = inlined_call_operand.hbm [shape: f32[1,8,128], index: 2, kind: output, shape index: {}]  }
   0x1   :  { %v12_v0 = vld [vmem:[%s173_s0] sm:$0xff] }
   0x2   :  { %7 = vsyncpa [#allocation3], 0  ;;  %v15_v1 = vsel %vm14_vm0, %v12_v0, -inf  ;;  %v131_v2 = vmov 1   ;;  %v13_v3 = vld [vmem:[%s174_s1] sm:$0xff]  ;;  %s132_s13 = smov 127  }
   0x3   :  { %16 = vmax.xlane.f32.xlu0 %v15_v1  ;;  %s133_s0 = smov 1   ;;  %vm65_vm1 = vcmask 7168   ;;  %s134_s1 = smov [#allocation2]  }
   0x4   :  { %98 = vset.pattern.permute.xlu0 %v131_v2  ;;  %s84_s14 = sshll.u32 %s134_s1, 4  ;;  %s85_s14 = int_to_ptr.vmem [resolvable:$true] %s84_s14 }
   0x5   :  { %s107_s16 = scalar_lea.vmem %s85_s14, 128  ;;  %p112_p1 = scmp.lt.s32.totalorder %s85_s14, %s85_s14 }
   0x6   :  { %p108_p0 = scmp.ne.s32.totalorder %s85_s14, %s107_s16  ;;  %p113_p2 = scmp.lt.s32.totalorder %s107_s16, %s107_s16 }
   0x8   :  { %p114_p3 = por %p113_p2, %p112_p1 }
   0xa   :  { %p115_p4 = pnand %p114_p3, %p108_p0 }
  0x90   :  { %v17_v4 = vpop.xlane.xlu0 %16 }
  0x91   :  { %v18_v5 = vmax.f32 %v17_v4, %v13_v3 }
  0x93   :  { %30 = vrot.lane.b32.xlu1 %v18_v5, %s132_s13  ;;  %21 = vperm.xlu0 %98, %v18_v5   ;;  %v38_v10 = vsub.f32 %v13_v3, %v18_v5 }
  0x95   :  { %v39_v12 = vmul.f32 1.442695, %v38_v10 }
 0x105   :  { %v31_v14 = vpop.permute.xlu1 %30 }
 0x106   :  { %v33_v15 = vsub.f32 %v13_v3, %v31_v14 }
 0x108   :  { %v34_v16 = vmul.f32 1.442695, %v33_v15 }
 0x112   :  { %v22_v6 = vpop.permute.xlu0 %21 }
 0x113   :  { %v24_v7 = vsub.f32 %v12_v0, %v22_v6 }
 0x115   :  { %v25_v8 = vmul.f32 1.442695, %v24_v7 }
 0x117   :  { %99 = vpow2.f32 %v25_v8 }
 0x118   :  { %101 = vpow2.f32 %v39_v12 }
 0x119   :  { %103 = vpow2.f32 %v34_v16 }
 0x121   :  { %v100_v9 = vpop.eup %99 }
 0x122   :  { %v27_v11 = vsel %vm14_vm0, %v100_v9, 0.0  ;;  %v102_v13 = vpop.eup %101 }
 0x123   :  { %28 = vadd.xlane.f32.xlu1 %v27_v11  ;;  %v104_v17 = vpop.eup %103 }
 0x134   :  { %42 = vrot.lane.b32.xlu1 %v102_v13, %s132_s13 }
 0x1b0   :  { %v29_v18 = vpop.xlane.xlu1 %28 }
 0x1b1   :  { %v36_v19 = vsub.f32 %v29_v18, %v104_v17 }
 0x1b3   :  { %v37_v20 = vmax.f32 %v36_v19, 0.0 }
 0x1b4   :  { %v43_v21 = vpop.permute.xlu1 %42 }
 0x1b5   :  { %v45_v22 = vadd.f32 %v43_v21, %v37_v20 }
 0x1b7   :  { %105 = vlog2.f32 %v45_v22 }
 0x1c1   :  { %v106_v23 = vpop.eup %105 }
 0x1c2   :  { %v47_v24 = vmul.f32 0.6931472, %v106_v23 }
 0x1c4   :  { %49 = vrot.lane.b32.xlu0 %v47_v24, %s133_s0 }
 0x236   :  { %v50_v25 = vpop.permute.xlu0 %49 }
 0x237   :  { %v52_v26 = vadd.f32 %v50_v25, %v18_v5 }
 0x239   :  { %v53_v27 = vsub.f32 %v52_v26, %v13_v3 }
 0x23b   :  { %62 = vrot.lane.b32.xlu0 %v53_v27, %s132_s13 }
 0x2ad   :  { %v63_v28 = vpop.permute.xlu0 %62 }
 0x2ae   :  { %v66_v29 = vsel %vm65_vm1, %v63_v28, 0.0 }
 0x2af   :  { %67 = vadd.xlane.f32.xlu0 %v66_v29 }
 0x33c   :  { %v68_v30 = vpop.xlane.xlu0 %67 }
 0x33d   :  { %v69_v31 = vrot.slane %v68_v30, 4 }
 0x33f   :  { %v70_v32 = vadd.f32 %v69_v31, %v68_v30 }
 0x341   :  { %v71_v33 = vrot.slane %v70_v32, 2 }
 0x343   :  { %v72_v34 = vadd.f32 %v71_v33, %v70_v32 }
 0x345   :  { %v73_v35 = vrot.slane %v72_v34, 1 }
 0x347   :  { %v74_v36 = vadd.f32 %v73_v35, %v72_v34 }
 0x349   :  { %92 = vpush %v74_v36 }
 0x37a   :  { %s93_s15 = spop %92 }
 0x37b   :  { %v76_v37 = vstv %s93_s15 }
 0x37c   :  { %77 = vst [vmem:[#allocation2] sm:$0xff] %v76_v37 }
 0x37d   :  { %118 = shalt.err (!%p115_p4)
}
 0x37e   :  { %s119_s19 = scalar_lea.hbm %s175_s2, 128 }
 0x37f   :  { %p120_p5 = scmp.ne.s32.totalorder %s175_s2, %s119_s19  ;;  %p123_p6 = scmp.lt.u32.totalorder %s119_s19, %s175_s2 }
 0x381   :  { %p125_p7 = pnand %p123_p6, %p120_p5 }
 0x383   :  { %128 = shalt.err (!%p125_p7)
}
 0x384   :  { %87 = dma.vmem_to_hbm [thread:$0]  %s85_s14, 128, %s175_s2, [#allocation3]  }
 0x385   :  { %129 = dma.done.wait [#allocation3], 128  }
 0x386   :  { %130 = vsyncadd [#allocation3], 4294967168 }
 0x387   :  { %91 = vsyncpa [#allocation3], 1 }

</bundles_post_ra>
